<compile_context>
chip_gen: v7x
topology: tpu7x:2x2x1
jax: 0.10.0
libtpu: 0.0.40
codegen_flags: <defaults>
</compile_context>

<pallas_src>
import time
import functools

import jax
import jax.numpy as jnp
from jax.experimental import pallas as pl
from jax.experimental.pallas import tpu as pltpu


def _round_up(x, m):
    return ((x + m - 1) // m) * m


# ----------------------------------------------------------------------------
# Fused Pallas kernel: client matmul (K-tiled, accumulated) + client epilogue
# + both server layers, emitted on the last K step.
# ----------------------------------------------------------------------------
def _fused_kernel(x_ref, w0_ref, b0_ref, w1_ref, b1_ref, w2_ref, b2_ref,
                  h_ref, o_ref, acc_ref):
    k = pl.program_id(1)

    @pl.when(k == 0)
    def _():
        acc_ref[...] = jnp.zeros_like(acc_ref)

    # Client matmul partial product on the MXU (bf16 operands, f32 accumulate).
    acc_ref[...] += jnp.dot(x_ref[...], w0_ref[...],
                            preferred_element_type=jnp.float32)

    @pl.when(k == pl.num_programs(1) - 1)
    def _():
        # Client epilogue in f32 on the VPU: bias + ReLU -> cut-layer activation.
        h = jnp.maximum(acc_ref[...] + b0_ref[...], 0.0)
        h_ref[...] = h.astype(h_ref.dtype)

        # Server segment, fused: relu(h @ w1 + b1) @ w2 + b2.
        # Matmul operands in bf16 (MXU-native), epilogues in f32.
        z = jnp.maximum(
            jnp.dot(h.astype(w1_ref.dtype), w1_ref[...],
                    preferred_element_type=jnp.float32) + b1_ref[...], 0.0)
        o_ref[...] = (jnp.dot(z.astype(w2_ref.dtype), w2_ref[...],
                              preferred_element_type=jnp.float32)
                      + b2_ref[...]).astype(o_ref.dtype)


def _fused_pallas(x_pad, w0, b0, w1p, b1p, w2p, b2p, *, tm, tk):
    Bp, Dp = x_pad.shape
    H = w0.shape[1]        # cut-layer width (128, lane-aligned)
    H2P = w1p.shape[1]     # hidden2 padded to 128
    NP = w2p.shape[1]      # n_classes padded to 128
    grid = (Bp // tm, Dp // tk)

    return pl.pallas_call(
        _fused_kernel,
        out_shape=(jax.ShapeDtypeStruct((Bp, H), jnp.float32),
                   jax.ShapeDtypeStruct((Bp, NP), jnp.float32)),
        grid_spec=pltpu.PrefetchScalarGridSpec(
            num_scalar_prefetch=0,
            grid=grid,
            in_specs=[
                pl.BlockSpec((tm, tk), lambda i, k: (i, k)),    # x tile
                pl.BlockSpec((tk, H), lambda i, k: (k, 0)),     # w0 K-slab
                pl.BlockSpec((1, H), lambda i, k: (0, 0)),      # b0
                pl.BlockSpec((H, H2P), lambda i, k: (0, 0)),    # w1 (padded)
                pl.BlockSpec((1, H2P), lambda i, k: (0, 0)),    # b1 (padded)
                pl.BlockSpec((H2P, NP), lambda i, k: (0, 0)),   # w2 (padded)
                pl.BlockSpec((1, NP), lambda i, k: (0, 0)),     # b2 (padded)
            ],
            out_specs=[
                pl.BlockSpec((tm, H), lambda i, k: (i, 0)),     # intermediate h
                pl.BlockSpec((tm, NP), lambda i, k: (i, 0)),    # logits (padded)
            ],
            scratch_shapes=[pltpu.VMEM((tm, H), jnp.float32)],  # f32 accumulator
        ),
        compiler_params=pltpu.CompilerParams(
            dimension_semantics=("parallel", "arbitrary")),
    )(x_pad, w0, b0, w1p, b1p, w2p, b2p)


@functools.partial(jax.jit, static_argnames=("tm", "tk", "n_classes"))
def fused_forward(x_flat, w0, b0, w1p, b1p, w2p, b2p, *, tm, tk, n_classes):
    """Pad batch/d_in, cast activations to bf16, run the fused kernel, unpad."""
    B, D0 = x_flat.shape
    Dp = w0.shape[0]
    Bp = _round_up(max(B, tm), tm)
    x_pad = jnp.pad(x_flat.astype(jnp.bfloat16),
                    ((0, Bp - B), (0, Dp - D0)))
    h_pad, o_pad = _fused_pallas(x_pad, w0, b0, w1p, b1p, w2p, b2p, tm=tm, tk=tk)
    return h_pad[:B], o_pad[:B, :n_classes]


# ----------------------------------------------------------------------------
# Parameter preparation: bf16 weights, zero-padding to lane-dense shapes.
# ----------------------------------------------------------------------------
def prepare_params(p, *, tk, lane=128):
    d_in, hidden = p["w0"].shape
    hidden2, n_classes = p["w2"].shape
    assert hidden % lane == 0, "cut-layer width must be a multiple of 128 lanes"
    d_pad = _round_up(d_in, tk)
    h2p = _round_up(hidden2, lane)
    ncp = _round_up(n_classes, lane)
    return {
        "w0": jnp.pad(p["w0"], ((0, d_pad - d_in), (0, 0))).astype(jnp.bfloat16),
        "b0": p["b0"].reshape(1, hidden).astype(jnp.float32),
        "w1": jnp.pad(p["w1"], ((0, 0), (0, h2p - hidden2))).astype(jnp.bfloat16),
        "b1": jnp.pad(p["b1"].reshape(1, hidden2),
                      ((0, 0), (0, h2p - hidden2))).astype(jnp.float32),
        "w2": jnp.pad(p["w2"], ((0, h2p - hidden2),
                                (0, ncp - n_classes))).astype(jnp.bfloat16),
        "b2": jnp.pad(p["b2"].reshape(1, n_classes),
                      ((0, 0), (0, ncp - n_classes))).astype(jnp.float32),
    }


# ----------------------------------------------------------------------------
# MultiSplitNN equivalent (forward pass only; optimizer / PySyft plumbing of
# the original class is orchestration, not compute).
# ----------------------------------------------------------------------------
class MultiSplitNNPallas:
    def __init__(self, params_f32, *, tm=None, tk=None):
        d_in = params_f32["w0"].shape[0]
        # K tile: cover the whole (128-aligned) input when small so the client
        # matmul is a single grid step; cap at 2048 to keep VMEM modest on v7x.
        self.tk = tk if tk is not None else min(_round_up(d_in, 128), 2048)
        self.tm = tm                       # None => chosen per batch in forward
        self.hidden = params_f32["w0"].shape[1]
        self.n_classes = params_f32["w2"].shape[1]
        self.prepared = prepare_params(params_f32, tk=self.tk)
        self.outputs = [None, None]
        self.inputs = [None, None]

    def forward(self, x_nchw):
        B = x_nchw.shape[0]
        x_flat = x_nchw.reshape(B, -1)              # torch.flatten(x, 1) equivalent
        self.inputs[0] = x_flat

        # Batch tile: multiple of 16 sublanes (bf16 packing), capped at 256.
        tm = self.tm if self.tm is not None else min(_round_up(B, 16), 256)

        # Both segments run in ONE fused pallas_call; the detach at the split
        # boundary only affects the training graph, values are identical.
        # TODO(synk): per-segment client/server timing is not recoverable from a
        # fused kernel via time.time(); use an xprof trace for that breakdown.
        t0 = time.time()
        p = self.prepared
        h, logits = fused_forward(x_flat, p["w0"], p["b0"], p["w1"], p["b1"],
                                  p["w2"], p["b2"], tm=tm, tk=self.tk,
                                  n_classes=self.n_classes)
        jax.block_until_ready((h, logits))
        total = time.time() - t0

        intermediate = h                            # cut-layer activation (.copy())
        self.outputs[0] = h
        self.inputs[1] = jax.lax.stop_gradient(h)   # .detach().requires_grad_()
        # TODO(synk): .move(location)/.send() are PySyft device transfers; no Pallas equivalent.
        self.outputs[1] = logits

        forward_clients = total                     # combined fused-call wall time
        forward_server = 0.0
        return (self.outputs[1], forward_clients, forward_server, intermediate)

    def forwardVal(self, x_nchw):
        out, _, _, intermediate = self.forward(x_nchw)
        return (out, intermediate)


# ----------------------------------------------------------------------------
# Deterministic parameter init + demo run
# ----------------------------------------------------------------------------
def init_params(key, d_in, hidden, hidden2, n_classes):
    k0, k1, k2 = jax.random.split(key, 3)
    return {
        "w0": jax.random.normal(k0, (d_in, hidden), jnp.float32) / jnp.sqrt(d_in),
        "b0": jnp.zeros((1, hidden), jnp.float32),
        "w1": jax.random.normal(k1, (hidden, hidden2), jnp.float32) / jnp.sqrt(hidden),
        "b1": jnp.zeros((1, hidden2), jnp.float32),
        "w2": jax.random.normal(k2, (hidden2, n_classes), jnp.float32) / jnp.sqrt(hidden2),
        "b2": jnp.zeros((1, n_classes), jnp.float32),
    }


if __name__ == "__main__":
    key = jax.random.PRNGKey(0)
    kx, kp = jax.random.split(key)

    B, C, H, W = 2, 4, 16, 16                      # NCHW, small synthetic shapes
    hidden, hidden2, n_classes = 128, 64, 10
    d_in = C * H * W

    x = jax.random.normal(kx, (B, C, H, W), jnp.float32)
    params = init_params(kp, d_in, hidden, hidden2, n_classes)

    model = MultiSplitNNPallas(params)
    logits, t_client, t_server, intermediate = model.forward(x)
    jax.block_until_ready((logits, intermediate))

    # Pure-JAX reference of the same computation (bf16 weights/activations for
    # the matmuls, f32 accumulation + f32 epilogues), to validate the kernel.
    def _bf(a):
        return a.astype(jnp.bfloat16).astype(jnp.float32)

    x_flat = x.reshape(B, -1)
    ref_h = jnp.maximum(_bf(x_flat) @ _bf(params["w0"]) + params["b0"], 0.0)
    ref_z = jnp.maximum(_bf(ref_h) @ _bf(params["w1"]) + params["b1"], 0.0)
    ref_o = _bf(ref_z) @ _bf(params["w2"]) + params["b2"]

    assert logits.shape == (B, n_classes)
    assert intermediate.shape == (B, hidden)
    assert jnp.allclose(intermediate, ref_h, atol=1e-2, rtol=1e-2)
    assert jnp.allclose(logits, ref_o, atol=1e-2, rtol=1e-2)

    print("KERNEL_OK")
</pallas_src>

<mosaic_0001>
module attributes {stable_mosaic.version = 11 : i64} {
  func.func @_fused_kernel(%arg0: i32, %arg1: i32, %arg2: memref<16x1024xbf16, #tpu.memory_space<vmem>>, %arg3: memref<1024x128xbf16, #tpu.memory_space<vmem>>, %arg4: memref<1x128xf32, #tpu.memory_space<vmem>>, %arg5: memref<128x128xbf16, #tpu.memory_space<vmem>>, %arg6: memref<1x128xf32, #tpu.memory_space<vmem>>, %arg7: memref<128x128xbf16, #tpu.memory_space<vmem>>, %arg8: memref<1x128xf32, #tpu.memory_space<vmem>>, %arg9: memref<16x128xf32, #tpu.memory_space<vmem>>, %arg10: memref<16x128xf32, #tpu.memory_space<vmem>>, %arg11: memref<16x128xf32, #tpu.memory_space<vmem>>) attributes {dimension_semantics = [#tpu.dimension_semantics<parallel>, #tpu.dimension_semantics<arbitrary>], iteration_bounds = array<i64: 1, 1>, scalar_prefetch = 0 : i64, scratch_operands = 1 : i64, tpu.core_type = #tpu.core_type<tc>, window_params = [{transform_indices = @transform_0, window_bounds = array<i64: 16, 1024>}, {transform_indices = @transform_1, window_bounds = array<i64: 1024, 128>}, {pipeline_mode = #tpu.pipeline_mode<synchronous>, transform_indices = @transform_2, window_bounds = array<i64: 1, 128>}, {pipeline_mode = #tpu.pipeline_mode<synchronous>, transform_indices = @transform_3, window_bounds = array<i64: 128, 128>}, {pipeline_mode = #tpu.pipeline_mode<synchronous>, transform_indices = @transform_4, window_bounds = array<i64: 1, 128>}, {pipeline_mode = #tpu.pipeline_mode<synchronous>, transform_indices = @transform_5, window_bounds = array<i64: 128, 128>}, {pipeline_mode = #tpu.pipeline_mode<synchronous>, transform_indices = @transform_6, window_bounds = array<i64: 1, 128>}, {transform_indices = @transform_7, window_bounds = array<i64: 16, 128>}, {transform_indices = @transform_8, window_bounds = array<i64: 16, 128>}]} {
    %c0_i32 = arith.constant 0 : i32
    %0 = arith.cmpi eq, %arg1, %c0_i32 : i32
    %1 = arith.extui %0 : i1 to i32
    %c0_i32_0 = arith.constant 0 : i32
    %2 = arith.cmpi ne, %1, %c0_i32_0 : i32
    scf.if %2 {
      %cst_10 = arith.constant 0.000000e+00 : f32
      %12 = vector.broadcast %cst_10 : f32 to vector<16x128xf32>
      %c0_11 = arith.constant 0 : index
      %c0_12 = arith.constant 0 : index
      %13 = vector.load %arg11[%c0_11, %c0_12] : memref<16x128xf32, #tpu.memory_space<vmem>>, vector<16x128xf32>
      tpu.vector_store %arg11[%c0_11, %c0_12], %12 {strides = array<i32>} : memref<16x128xf32, #tpu.memory_space<vmem>>, vector<16x128xf32>,
    } else {
    }
    %c0 = arith.constant 0 : index
    %c0_1 = arith.constant 0 : index
    %3 = vector.load %arg11[%c0, %c0_1] : memref<16x128xf32, #tpu.memory_space<vmem>>, vector<16x128xf32>
    %c0_2 = arith.constant 0 : index
    %c0_3 = arith.constant 0 : index
    %4 = vector.load %arg2[%c0_2, %c0_3] : memref<16x1024xbf16, #tpu.memory_space<vmem>>, vector<16x1024xbf16>
    %c0_4 = arith.constant 0 : index
    %c0_5 = arith.constant 0 : index
    %5 = vector.load %arg3[%c0_4, %c0_5] : memref<1024x128xbf16, #tpu.memory_space<vmem>>, vector<1024x128xbf16>
    %cst = arith.constant dense<0.000000e+00> : vector<16x128xf32>
    %6 = tpu.matmul %4, %5, %cst {dimension_numbers = #tpu.dot_dimension_numbers<[1], [0], [0], [1], [0, 0, 1, 1], [], []>} : vector<16x1024xbf16>, vector<1024x128xbf16>, vector<16x128xf32> -> vector<16x128xf32>
    %7 = arith.addf %3, %6 : vector<16x128xf32>
    %c0_6 = arith.constant 0 : index
    %c0_7 = arith.constant 0 : index
    %8 = vector.load %arg11[%c0_6, %c0_7] : memref<16x128xf32, #tpu.memory_space<vmem>>, vector<16x128xf32>
    tpu.vector_store %arg11[%c0_6, %c0_7], %7 {strides = array<i32>} : memref<16x128xf32, #tpu.memory_space<vmem>>, vector<16x128xf32>,
    %c0_i32_8 = arith.constant 0 : i32
    %9 = arith.cmpi eq, %arg1, %c0_i32_8 : i32
    %10 = arith.extui %9 : i1 to i32
    %c0_i32_9 = arith.constant 0 : i32
    %11 = arith.cmpi ne, %10, %c0_i32_9 : i32
    scf.if %11 {
      %c0_10 = arith.constant 0 : index
      %c0_11 = arith.constant 0 : index
      %12 = vector.load %arg11[%c0_10, %c0_11] : memref<16x128xf32, #tpu.memory_space<vmem>>, vector<16x128xf32>
      %c0_12 = arith.constant 0 : index
      %c0_13 = arith.constant 0 : index
      %13 = vector.load %arg4[%c0_12, %c0_13] : memref<1x128xf32, #tpu.memory_space<vmem>>, vector<1x128xf32>
      %14 = vector.broadcast %13 : vector<1x128xf32> to vector<16x128xf32>
      %15 = arith.addf %12, %14 : vector<16x128xf32>
      %cst_14 = arith.constant 0.000000e+00 : f32
      %16 = vector.broadcast %cst_14 : f32 to vector<16x128xf32>
      %17 = arith.maximumf %15, %16 : vector<16x128xf32>
      %c0_15 = arith.constant 0 : index
      %c0_16 = arith.constant 0 : index
      %18 = vector.load %arg9[%c0_15, %c0_16] : memref<16x128xf32, #tpu.memory_space<vmem>>, vector<16x128xf32>
      tpu.vector_store %arg9[%c0_15, %c0_16], %17 {strides = array<i32>} : memref<16x128xf32, #tpu.memory_space<vmem>>, vector<16x128xf32>,
      %19 = arith.truncf %17 : vector<16x128xf32> to vector<16x128xbf16>
      %c0_17 = arith.constant 0 : index
      %c0_18 = arith.constant 0 : index
      %20 = vector.load %arg5[%c0_17, %c0_18] : memref<128x128xbf16, #tpu.memory_space<vmem>>, vector<128x128xbf16>
      %cst_19 = arith.constant dense<0.000000e+00> : vector<16x128xf32>
      %21 = tpu.matmul %19, %20, %cst_19 {dimension_numbers = #tpu.dot_dimension_numbers<[1], [0], [0], [1], [0, 0, 1, 1], [], []>} : vector<16x128xbf16>, vector<128x128xbf16>, vector<16x128xf32> -> vector<16x128xf32>
      %c0_20 = arith.constant 0 : index
      %c0_21 = arith.constant 0 : index
      %22 = vector.load %arg6[%c0_20, %c0_21] : memref<1x128xf32, #tpu.memory_space<vmem>>, vector<1x128xf32>
      %23 = vector.broadcast %22 : vector<1x128xf32> to vector<16x128xf32>
      %24 = arith.addf %21, %23 : vector<16x128xf32>
      %cst_22 = arith.constant 0.000000e+00 : f32
      %25 = vector.broadcast %cst_22 : f32 to vector<16x128xf32>
      %26 = arith.maximumf %24, %25 : vector<16x128xf32>
      %27 = arith.truncf %26 : vector<16x128xf32> to vector<16x128xbf16>
      %c0_23 = arith.constant 0 : index
      %c0_24 = arith.constant 0 : index
      %28 = vector.load %arg7[%c0_23, %c0_24] : memref<128x128xbf16, #tpu.memory_space<vmem>>, vector<128x128xbf16>
      %cst_25 = arith.constant dense<0.000000e+00> : vector<16x128xf32>
      %29 = tpu.matmul %27, %28, %cst_25 {dimension_numbers = #tpu.dot_dimension_numbers<[1], [0], [0], [1], [0, 0, 1, 1], [], []>} : vector<16x128xbf16>, vector<128x128xbf16>, vector<16x128xf32> -> vector<16x128xf32>
      %c0_26 = arith.constant 0 : index
      %c0_27 = arith.constant 0 : index
      %30 = vector.load %arg8[%c0_26, %c0_27] : memref<1x128xf32, #tpu.memory_space<vmem>>, vector<1x128xf32>
      %31 = vector.broadcast %30 : vector<1x128xf32> to vector<16x128xf32>
      %32 = arith.addf %29, %31 : vector<16x128xf32>
      %c0_28 = arith.constant 0 : index
      %c0_29 = arith.constant 0 : index
      %33 = vector.load %arg10[%c0_28, %c0_29] : memref<16x128xf32, #tpu.memory_space<vmem>>, vector<16x128xf32>
      tpu.vector_store %arg10[%c0_28, %c0_29], %32 {strides = array<i32>} : memref<16x128xf32, #tpu.memory_space<vmem>>, vector<16x128xf32>,
    } else {
    }
    return
  }
  func.func @transform_0(%arg0: i32, %arg1: i32) -> (i32, i32) {
    %c0_i32 = arith.constant 0 : i32
    return %arg0, %arg1 : i32, i32
  }
  func.func @transform_1(%arg0: i32, %arg1: i32) -> (i32, i32) {
    %c0_i32 = arith.constant 0 : i32
    %c0_i32_0 = arith.constant 0 : i32
    return %arg1, %c0_i32 : i32, i32
  }
  func.func @transform_2(%arg0: i32, %arg1: i32) -> (i32, i32) {
    %c0_i32 = arith.constant 0 : i32
    %c0_i32_0 = arith.constant 0 : i32
    %c0_i32_1 = arith.constant 0 : i32
    return %c0_i32, %c0_i32_0 : i32, i32
  }
  func.func @transform_3(%arg0: i32, %arg1: i32) -> (i32, i32) {
    %c0_i32 = arith.constant 0 : i32
    %c0_i32_0 = arith.constant 0 : i32
    %c0_i32_1 = arith.constant 0 : i32
    return %c0_i32, %c0_i32_0 : i32, i32
  }
  func.func @transform_4(%arg0: i32, %arg1: i32) -> (i32, i32) {
    %c0_i32 = arith.constant 0 : i32
    %c0_i32_0 = arith.constant 0 : i32
    %c0_i32_1 = arith.constant 0 : i32
    return %c0_i32, %c0_i32_0 : i32, i32
  }
  func.func @transform_5(%arg0: i32, %arg1: i32) -> (i32, i32) {
    %c0_i32 = arith.constant 0 : i32
    %c0_i32_0 = arith.constant 0 : i32
    %c0_i32_1 = arith.constant 0 : i32
    return %c0_i32, %c0_i32_0 : i32, i32
  }
  func.func @transform_6(%arg0: i32, %arg1: i32) -> (i32, i32) {
    %c0_i32 = arith.constant 0 : i32
    %c0_i32_0 = arith.constant 0 : i32
    %c0_i32_1 = arith.constant 0 : i32
    return %c0_i32, %c0_i32_0 : i32, i32
  }
  func.func @transform_7(%arg0: i32, %arg1: i32) -> (i32, i32) {
    %c0_i32 = arith.constant 0 : i32
    %c0_i32_0 = arith.constant 0 : i32
    return %arg0, %c0_i32 : i32, i32
  }
  func.func @transform_8(%arg0: i32, %arg1: i32) -> (i32, i32) {
    %c0_i32 = arith.constant 0 : i32
    %c0_i32_0 = arith.constant 0 : i32
    return %arg0, %c0_i32 : i32, i32
  }
}

</mosaic_0001>

<bundles_post_ra>
// kernel: fused_forward.1
= control target key start
LH: loop header
LB: loop body
LE: loop exit
PB: predicated region body
PF: predicated region fallthrough
CT: control target
= control target key end

     0   :  { %14 = vsyncpa [#allocation4], 0  ;;  %s1584_s0 = inlined_call_operand.vmem [shape: bf16[16,1024], index: 0, kind: input, shape index: {}]   ;;  %s1585_s1 = inlined_call_operand.hbm [shape: bf16[1024,128], index: 1, kind: input, shape index: {}]   ;;  %s1586_s2 = inlined_call_operand.vmem [shape: f32[1,128], index: 2, kind: input, shape index: {}]   ;;  %s1587_s3 = inlined_call_operand.vmem [shape: bf16[128,128], index: 3, kind: input, shape index: {}]   ;;  %s1588_s4 = inlined_call_operand.vmem [shape: f32[1,128], index: 4, kind: input, shape index: {}]   ;;  %s1589_s5 = inlined_call_operand.hbm [shape: bf16[128,128], index: 5, kind: input, shape index: {}]   ;;  %s1590_s6 = inlined_call_operand.vmem [shape: f32[1,128], index: 6, kind: input, shape index: {}]   ;;  %s1591_s7 = inlined_call_operand.vmem [shape: f32[16,128], index: 7, kind: output, shape index: {0}]   ;;  %s1592_s8 = inlined_call_operand.vmem [shape: f32[16,128], index: 8, kind: output, shape index: {1}]  }
   0x1   :  { %15 = vsyncpa [#allocation6], 0  ;;  %s1422_s27 = smov [#allocation3]   ;;  %s1374_s9 = scalar_lea.hbm %s1585_s1, 8192 }
   0x2   :  { %s23_s28 = sshll.u32 %s1422_s27, 4  ;;  %p1375_p0 = scmp.ne.s32.totalorder %s1585_s1, %s1374_s9  ;;  %s24_s28 = int_to_ptr.vmem [resolvable:$true] %s23_s28 }
   0x3   :  { %p1378_p1 = scmp.lt.u32.totalorder %s1374_s9, %s1585_s1 }
   0x5   :  { %p1380_p2 = pnand %p1378_p1, %p1375_p0 }
   0x7   :  { %1383 = shalt.err (!%p1380_p2)
}
   0x8   :  { %s1384_s14 = scalar_lea.vmem %s24_s28, 8192  ;;  %p1389_p4 = scmp.lt.s32.totalorder %s24_s28, %s24_s28 }
   0x9   :  { %p1385_p3 = scmp.ne.s32.totalorder %s24_s28, %s1384_s14  ;;  %p1390_p5 = scmp.lt.s32.totalorder %s1384_s14, %s1384_s14 }
   0xb   :  { %p1391_p6 = por %p1390_p5, %p1389_p4 }
   0xd   :  { %p1392_p7 = pnand %p1391_p6, %p1385_p3 }
   0xf   :  { %1395 = shalt.err (!%p1392_p7)
}
  0x10   :  { %s1423_s15 = smov 64   ;;  %s1424_s16 = smov 4  }
  0x11   :  { %29 = dma.hbm_to_vmem [thread:$0]  %s1585_s1, 8192, %s24_s28, [#allocation4], %s1423_s15, %s1423_s15, %s1424_s16  }
  0x12   :  { %s1425_s19 = smov [#allocation5]   ;;  %s1396_s23 = scalar_lea.hbm %s1589_s5, 1024 }
  0x13   :  { %s41_s20 = sshll.u32 %s1425_s19, 4  ;;  %p1397_p8 = scmp.ne.s32.totalorder %s1589_s5, %s1396_s23  ;;  %s42_s20 = int_to_ptr.vmem [resolvable:$true] %s41_s20 }
  0x14   :  { %p1400_p9 = scmp.lt.u32.totalorder %s1396_s23, %s1589_s5 }
  0x16   :  { %p1402_p10 = pnand %p1400_p9, %p1397_p8 }
  0x18   :  { %1405 = shalt.err (!%p1402_p10)
}
  0x19   :  { %s1406_s29 = scalar_lea.vmem %s42_s20, 1024  ;;  %p1411_p12 = scmp.lt.s32.totalorder %s42_s20, %s42_s20 }
  0x1a   :  { %p1407_p11 = scmp.ne.s32.totalorder %s42_s20, %s1406_s29  ;;  %p1412_p13 = scmp.lt.s32.totalorder %s1406_s29, %s1406_s29 }
  0x1c   :  { %p1413_p0 = por %p1412_p13, %p1411_p12 }
  0x1e   :  { %p1414_p1 = pnand %p1413_p0, %p1407_p11 }
  0x20   :  { %1417 = shalt.err (!%p1414_p1)
}
  0x21   :  { %47 = dma.hbm_to_vmem [thread:$0]  %s1589_s5, 1024, %s42_s20, [#allocation6], %s1423_s15, %s1423_s15, %s1424_s16  }
  0x22   :  { %1418 = dma.done.wait [#allocation4], 8192  }
  0x23   :  { %1419 = vsyncadd [#allocation4], 4294959104 }
  0x24   :  { %1420 = dma.done.wait [#allocation6], 1024  }
  0x25   :  { %1421 = vsyncadd [#allocation6], 4294966272  ;;  %v1294_v0 = vld [vmem:[#allocation3 + $0x40] sm:$0xff]   ;;  %v1298_v4 = vld [vmem:[#allocation3 + $0x48] sm:$0xff]   ;;  %vm1427_vm0 = vmmov 0  }
  0x26   :  { %v1295_v1 = vld [vmem:[#allocation3 + $0xc0] sm:$0xff]   ;;  %1142 = vmatprep.subr.bf16.mxu0 %v1294_v0  ;;  %v1299_v5 = vld [vmem:[#allocation3 + $0xc8] sm:$0xff]   ;;  %v1302_v8 = vld [vmem:[#allocation3 + $0x50] sm:$0xff]  }
  0x27   :  { %v1296_v2 = vld [vmem:[#allocation3] sm:$0xff]   ;;  %1164 = vmatprep.subr.bf16.mxu1 %v1295_v1  ;;  %v1300_v6 = vld [vmem:[#allocation3 + $0x8] sm:$0xff]   ;;  %v1303_v9 = vld [vmem:[#allocation3 + $0xd0] sm:$0xff]  }
  0x28   :  { %v1297_v3 = vld [vmem:[#allocation3 + $0x80] sm:$0xff]   ;;  %1143 = vmatpush3.bf16.msra.mxu0 %v1296_v2  ;;  %v1301_v7 = vld [vmem:[#allocation3 + $0x88] sm:$0xff]   ;;  %v1304_v10 = vld [vmem:[#allocation3 + $0x10] sm:$0xff]  }
  0x29   :  { %1165 = vmatpush3.bf16.msra.mxu1 %v1297_v3  ;;  %1144 = vmatprep.subr.bf16.mxu0 %v1298_v4  ;;  %v1305_v11 = vld [vmem:[#allocation3 + $0x90] sm:$0xff]   ;;  %v1306_v12 = vld [vmem:[#allocation3 + $0x58] sm:$0xff]   ;;  %v1310_v16 = vld [vmem:[#allocation3 + $0x60] sm:$0xff]  }
  0x2a   :  { %1166 = vmatprep.subr.bf16.mxu1 %v1299_v5  ;;  %v1307_v13 = vld [vmem:[#allocation3 + $0xd8] sm:$0xff]   ;;  %v1311_v17 = vld [vmem:[#allocation3 + $0xe0] sm:$0xff]   ;;  %v1314_v20 = vld [vmem:[#allocation3 + $0x68] sm:$0xff]  }
  0x2b   :  { %v1308_v14 = vld [vmem:[#allocation3 + $0x18] sm:$0xff]   ;;  %v1312_v18 = vld [vmem:[#allocation3 + $0x20] sm:$0xff]   ;;  %v1315_v21 = vld [vmem:[#allocation3 + $0xe8] sm:$0xff]  }
  0x2c   :  { %1145 = vmatpush3.bf16.msra.mxu0 %v1300_v6  ;;  %v1309_v15 = vld [vmem:[#allocation3 + $0x98] sm:$0xff]   ;;  %v1313_v19 = vld [vmem:[#allocation3 + $0xa0] sm:$0xff]   ;;  %v1316_v22 = vld [vmem:[#allocation3 + $0x28] sm:$0xff]  }
  0x2d   :  { %1167 = vmatpush3.bf16.msra.mxu1 %v1301_v7  ;;  %1146 = vmatprep.subr.bf16.mxu0 %v1302_v8  ;;  %v1317_v23 = vld [vmem:[#allocation3 + $0xa8] sm:$0xff]   ;;  %v1318_v24 = vld [vmem:[#allocation3 + $0x70] sm:$0xff]   ;;  %v1322_v28 = vld [vmem:[#allocation3 + $0x78] sm:$0xff]  }
  0x2e   :  { %1168 = vmatprep.subr.bf16.mxu1 %v1303_v9  ;;  %v1319_v25 = vld [vmem:[#allocation3 + $0xf0] sm:$0xff]   ;;  %v1323_v29 = vld [vmem:[#allocation3 + $0xf8] sm:$0xff]   ;;  %v65_v32 = vld [vmem:[%s1584_s0] sm:$0xff] }
  0x2f   :  { %v1320_v26 = vld [vmem:[#allocation3 + $0x30] sm:$0xff]   ;;  %v1324_v30 = vld [vmem:[#allocation3 + $0x38] sm:$0xff]   ;;  %v69_v33 = vld [vmem:[%s1584_s0 + $0x20] sm:$0xff] }
  0x30   :  { %1147 = vmatpush3.bf16.msra.mxu0 %v1304_v10  ;;  %v1321_v27 = vld [vmem:[#allocation3 + $0xb0] sm:$0xff]   ;;  %v1325_v31 = vld [vmem:[#allocation3 + $0xb8] sm:$0xff]   ;;  %v66_v34 = vld [vmem:[%s1584_s0 + $0x8] sm:$0xff]  ;;  %v1051_v35 = vcombine.low %v65_v32, %v69_v33  ;;  %v1052_v36 = vcombine.high %v65_v32, %v69_v33 }
  0x31   :  { %1169 = vmatpush3.bf16.msra.mxu1 %v1305_v11  ;;  %1148 = vmatprep.subr.bf16.mxu0 %v1306_v12  ;;  %v70_v37 = vld [vmem:[%s1584_s0 + $0x28] sm:$0xff]  ;;  %v1326_v40 = vld [vmem:[#allocation3 + $0x140] sm:$0xff]   ;;  %v1334_v48 = vld [vmem:[#allocation3 + $0x150] sm:$0xff]  }
  0x32   :  { %1170 = vmatprep.subr.bf16.mxu1 %v1307_v13  ;;  %v1053_v38 = vcombine.low %v66_v34, %v70_v37  ;;  %v1054_v39 = vcombine.high %v66_v34, %v70_v37  ;;  %657 = vmatprep.mubr.bf16.mxu0 %v1052_v36  ;;  %v1327_v41 = vld [vmem:[#allocation3 + $0x1c0] sm:$0xff]   ;;  %v1330_v44 = vld [vmem:[#allocation3 + $0x148] sm:$0xff]   ;;  %v1335_v49 = vld [vmem:[#allocation3 + $0x1d0] sm:$0xff]  }
  0x33   :  { %v1328_v42 = vld [vmem:[#allocation3 + $0x100] sm:$0xff]   ;;  %v1331_v45 = vld [vmem:[#allocation3 + $0x1c8] sm:$0xff]   ;;  %v1336_v50 = vld [vmem:[#allocation3 + $0x110] sm:$0xff]  }
  0x34   :  { %1149 = vmatpush3.bf16.msra.mxu0 %v1308_v14  ;;  %698 = vmatprep.mubr.bf16.mxu1 %v1054_v39  ;;  %v1329_v43 = vld [vmem:[#allocation3 + $0x180] sm:$0xff]   ;;  %v1332_v46 = vld [vmem:[#allocation3 + $0x108] sm:$0xff]   ;;  %v1337_v51 = vld [vmem:[#allocation3 + $0x190] sm:$0xff]  }
  0x35   :  { %1171 = vmatpush3.bf16.msra.mxu1 %v1309_v15  ;;  %1150 = vmatprep.subr.bf16.mxu0 %v1310_v16  ;;  %v1333_v47 = vld [vmem:[#allocation3 + $0x188] sm:$0xff]   ;;  %v1338_v52 = vld [vmem:[#allocation3 + $0x158] sm:$0xff]   ;;  %v1342_v56 = vld [vmem:[#allocation3 + $0x160] sm:$0xff]  }
  0x36   :  { %1172 = vmatprep.subr.bf16.mxu1 %v1311_v17  ;;  %v1339_v53 = vld [vmem:[#allocation3 + $0x1d8] sm:$0xff]   ;;  %v1343_v57 = vld [vmem:[#allocation3 + $0x1e0] sm:$0xff]   ;;  %v1346_v60 = vld [vmem:[#allocation3 + $0x168] sm:$0xff]   ;;  %v1426_v17 = vmov 0.0  }
  0x37   :  { %v1340_v54 = vld [vmem:[#allocation3 + $0x118] sm:$0xff]   ;;  %v1344_v58 = vld [vmem:[#allocation3 + $0x120] sm:$0xff]   ;;  %v1347_v61 = vld [vmem:[#allocation3 + $0x1e8] sm:$0xff]  }
  0x38   :  { %1151 = vmatpush3.bf16.msra.mxu0 %v1312_v18  ;;  %v1341_v55 = vld [vmem:[#allocation3 + $0x198] sm:$0xff]   ;;  %v1345_v59 = vld [vmem:[#allocation3 + $0x1a0] sm:$0xff]   ;;  %v1348_v62 = vld [vmem:[#allocation3 + $0x128] sm:$0xff]  }
  0x39   :  { %1173 = vmatpush3.bf16.msra.mxu1 %v1313_v19  ;;  %1152 = vmatprep.subr.bf16.mxu0 %v1314_v20  ;;  %v1349_v63 = vld [vmem:[#allocation3 + $0x1a8] sm:$0xff]   ;;  %v1350_v0 = vld [vmem:[#allocation3 + $0x170] sm:$0xff]   ;;  %v1354_v4 = vld [vmem:[#allocation3 + $0x178] sm:$0xff]  }
  0x3a   :  { %1174 = vmatprep.subr.bf16.mxu1 %v1315_v21  ;;  %v1351_v1 = vld [vmem:[#allocation3 + $0x1f0] sm:$0xff]   ;;  %v1355_v5 = vld [vmem:[#allocation3 + $0x1f8] sm:$0xff]   ;;  %v1358_v16 = vld [vmem:[%s1587_s3] sm:$0xff]  }
  0x3b   :  { %v1352_v2 = vld [vmem:[#allocation3 + $0x130] sm:$0xff]   ;;  %v1356_v6 = vld [vmem:[#allocation3 + $0x138] sm:$0xff]   ;;  %v1359_v18 = vld [vmem:[%s1587_s3 + $0x8] sm:$0xff]  }
  0x3c   :  { %1153 = vmatpush3.bf16.msra.mxu0 %v1316_v22  ;;  %v1353_v3 = vld [vmem:[#allocation3 + $0x1b0] sm:$0xff]   ;;  %v1357_v7 = vld [vmem:[#allocation3 + $0x1b8] sm:$0xff]   ;;  %v1362_v21 = vld [vmem:[%s1587_s3 + $0x20] sm:$0xff]  }
  0x3d   :  { %1175 = vmatpush3.bf16.msra.mxu1 %v1317_v23  ;;  %1154 = vmatprep.subr.bf16.mxu0 %v1318_v24  ;;  %v67_v8 = vld [vmem:[%s1584_s0 + $0x10] sm:$0xff]  ;;  %v68_v12 = vld [vmem:[%s1584_s0 + $0x18] sm:$0xff]  ;;  %v1363_v22 = vld [vmem:[%s1587_s3 + $0x28] sm:$0xff]  }
  0x3e   :  { %1176 = vmatprep.subr.bf16.mxu1 %v1319_v25  ;;  %v71_v9 = vld [vmem:[%s1584_s0 + $0x30] sm:$0xff]  ;;  %v72_v13 = vld [vmem:[%s1584_s0 + $0x38] sm:$0xff]  ;;  %v1366_v25 = vld [vmem:[#allocation5] sm:$0xff]  }
  0x3f   :  { %v1055_v10 = vcombine.low %v67_v8, %v71_v9  ;;  %v1056_v11 = vcombine.high %v67_v8, %v71_v9  ;;  %v1057_v14 = vcombine.low %v68_v12, %v72_v13  ;;  %v1058_v15 = vcombine.high %v68_v12, %v72_v13  ;;  %v1360_v19 = vld [vmem:[%s1587_s3 + $0x10] sm:$0xff]   ;;  %v1361_v20 = vld [vmem:[%s1587_s3 + $0x18] sm:$0xff]  }
  0x40   :  { %1155 = vmatpush3.bf16.msra.mxu0 %v1320_v26  ;;  %v1364_v23 = vld [vmem:[%s1587_s3 + $0x30] sm:$0xff]   ;;  %v1365_v24 = vld [vmem:[%s1587_s3 + $0x38] sm:$0xff]   ;;  %v1367_v26 = vld [vmem:[#allocation5 + $0x8] sm:$0xff]  }
  0x41   :  { %1177 = vmatpush3.bf16.msra.mxu1 %v1321_v27  ;;  %1156 = vmatprep.subr.bf16.mxu0 %v1322_v28  ;;  %v1368_v27 = vld [vmem:[#allocation5 + $0x10] sm:$0xff]   ;;  %v1369_v28 = vld [vmem:[#allocation5 + $0x18] sm:$0xff]  }
  0x42   :  { %1178 = vmatprep.subr.bf16.mxu1 %v1323_v29  ;;  %v1370_v29 = vld [vmem:[#allocation5 + $0x20] sm:$0xff]  }
  0x44   :  { %1157 = vmatpush3.bf16.msra.mxu0 %v1324_v30  ;;  %v1371_v30 = vld [vmem:[#allocation5 + $0x28] sm:$0xff]  }
  0x45   :  { %1179 = vmatpush3.bf16.msra.mxu1 %v1325_v31  ;;  %1186 = vmatprep.subr.bf16.mxu0 %v1326_v40 }
  0x46   :  { %1208 = vmatprep.subr.bf16.mxu1 %v1327_v41 }
  0x47   :  { %658 = vmatmul.mubr.bf16.vlgmr.msra.gmra.mrb[0].mxu0 %v1051_v35 }
  0x48   :  { %699 = vmatmul.mubr.bf16.vlgmr.msra.gmra.mrb[0].mxu1 %v1053_v38  ;;  %1187 = vmatpush3.bf16.msra.mxu0 %v1328_v42 }
  0x49   :  { %1209 = vmatpush3.bf16.msra.mxu1 %v1329_v43  ;;  %1188 = vmatprep.subr.bf16.mxu0 %v1330_v44 }
  0x4a   :  { %1210 = vmatprep.subr.bf16.mxu1 %v1331_v45  ;;  %739 = vmatprep.mubr.bf16.mxu0 %v1056_v11 }
  0x4b   :  { %780 = vmatprep.mubr.bf16.mxu1 %v1058_v15  ;;  %v1133_v15 = vld [vmem:[%s1590_s6] ss:$0 sm:$0xff] }
  0x4c   :  { %1189 = vmatpush3.bf16.msra.mxu0 %v1332_v46 }
  0x4d   :  { %1211 = vmatpush3.bf16.msra.mxu1 %v1333_v47  ;;  %1190 = vmatprep.subr.bf16.mxu0 %v1334_v48 }
  0x4e   :  { %1212 = vmatprep.subr.bf16.mxu1 %v1335_v49 }
  0x50   :  { %1191 = vmatpush3.bf16.msra.mxu0 %v1336_v50 }
  0x51   :  { %1213 = vmatpush3.bf16.msra.mxu1 %v1337_v51  ;;  %1192 = vmatprep.subr.bf16.mxu0 %v1338_v52 }
  0x52   :  { %1214 = vmatprep.subr.bf16.mxu1 %v1339_v53 }
  0x54   :  { %1193 = vmatpush3.bf16.msra.mxu0 %v1340_v54 }
  0x55   :  { %1215 = vmatpush3.bf16.msra.mxu1 %v1341_v55  ;;  %1194 = vmatprep.subr.bf16.mxu0 %v1342_v56 }
  0x56   :  { %1216 = vmatprep.subr.bf16.mxu1 %v1343_v57  ;;  %v1123_v57 = vld [vmem:[%s1586_s2] ss:$0 sm:$0xff] }
  0x58   :  { %1195 = vmatpush3.bf16.msra.mxu0 %v1344_v58 }
  0x59   :  { %1217 = vmatpush3.bf16.msra.mxu1 %v1345_v59  ;;  %1196 = vmatprep.subr.bf16.mxu0 %v1346_v60 }
  0x5a   :  { %1218 = vmatprep.subr.bf16.mxu1 %v1347_v61 }
  0x5c   :  { %1197 = vmatpush3.bf16.msra.mxu0 %v1348_v62 }
  0x5d   :  { %1219 = vmatpush3.bf16.msra.mxu1 %v1349_v63  ;;  %1198 = vmatprep.subr.bf16.mxu0 %v1350_v0 }
  0x5e   :  { %1220 = vmatprep.subr.bf16.mxu1 %v1351_v1 }
  0x60   :  { %1199 = vmatpush3.bf16.msra.mxu0 %v1352_v2 }
  0x61   :  { %1221 = vmatpush3.bf16.msra.mxu1 %v1353_v3  ;;  %1200 = vmatprep.subr.bf16.mxu0 %v1354_v4  ;;  %v1372_v3 = vld [vmem:[#allocation5 + $0x30] sm:$0xff]   ;;  %v1373_v4 = vld [vmem:[#allocation5 + $0x38] sm:$0xff]  }
  0x62   :  { %1222 = vmatprep.subr.bf16.mxu1 %v1355_v5  ;;  %v1124_v5 = vld [vmem:[%s1588_s4] ss:$0 sm:$0xff] }
  0x64   :  { %1201 = vmatpush3.bf16.msra.mxu0 %v1356_v6 }
  0x65   :  { %1223 = vmatpush3.bf16.msra.mxu1 %v1357_v7  ;;  %1248 = vmatprep.subr.bf16.mxu0 %v1426_v17 }
  0x66   :  { %1268 = vmatprep.subr.bf16.mxu1 %v1426_v17 }
  0x67   :  { %740 = vmatmul.mubr.bf16.vlgmr.msra.gmra.mrb[4].mxu0 %v1055_v10 }
  0x68   :  { %781 = vmatmul.mubr.bf16.vlgmr.msra.gmra.mrb[4].mxu1 %v1057_v14  ;;  %1249 = vmatpush3.bf16.msra.mxu0 %v1358_v16 }
  0x69   :  { %1250 = vmatprep.subr.bf16.mxu0 %v1426_v17  ;;  %1264 = vmatprep.mubr.msk.bf16.mxu0 %vm1427_vm0, %v1426_v17 }
  0x6a   :  { %1284 = vmatprep.mubr.msk.bf16.mxu1 %vm1427_vm0, %v1426_v17  ;;  %1269 = vmatpush3.bf16.msra.mxu1 %v1366_v25 }
  0x6b   :  { %1270 = vmatprep.subr.bf16.mxu1 %v1426_v17 }
  0x6c   :  { %1251 = vmatpush3.bf16.msra.mxu0 %v1359_v18 }
  0x6d   :  { %1252 = vmatprep.subr.bf16.mxu0 %v1426_v17 }
  0x6e   :  { %1271 = vmatpush3.bf16.msra.mxu1 %v1367_v26 }
  0x6f   :  { %1272 = vmatprep.subr.bf16.mxu1 %v1426_v17 }
  0x70   :  { %1253 = vmatpush3.bf16.msra.mxu0 %v1360_v19 }
  0x71   :  { %1254 = vmatprep.subr.bf16.mxu0 %v1426_v17 }
  0x72   :  { %1273 = vmatpush3.bf16.msra.mxu1 %v1368_v27 }
  0x73   :  { %1274 = vmatprep.subr.bf16.mxu1 %v1426_v17 }
  0x74   :  { %1255 = vmatpush3.bf16.msra.mxu0 %v1361_v20 }
  0x75   :  { %1256 = vmatprep.subr.bf16.mxu0 %v1426_v17 }
  0x76   :  { %1275 = vmatpush3.bf16.msra.mxu1 %v1369_v28 }
  0x77   :  { %1276 = vmatprep.subr.bf16.mxu1 %v1426_v17 }
  0x78   :  { %1257 = vmatpush3.bf16.msra.mxu0 %v1362_v21 }
  0x79   :  { %1258 = vmatprep.subr.bf16.mxu0 %v1426_v17 }
  0x7a   :  { %1277 = vmatpush3.bf16.msra.mxu1 %v1370_v29 }
  0x7b   :  { %1278 = vmatprep.subr.bf16.mxu1 %v1426_v17 }
  0x7c   :  { %1259 = vmatpush3.bf16.msra.mxu0 %v1363_v22 }
  0x7d   :  { %1260 = vmatprep.subr.bf16.mxu0 %v1426_v17 }
  0x7e   :  { %1279 = vmatpush3.bf16.msra.mxu1 %v1371_v30 }
  0x7f   :  { %1280 = vmatprep.subr.bf16.mxu1 %v1426_v17 }
  0x80   :  { %1261 = vmatpush3.bf16.msra.mxu0 %v1364_v23 }
  0x81   :  { %1262 = vmatprep.subr.bf16.mxu0 %v1426_v17 }
  0x82   :  { %1281 = vmatpush3.bf16.msra.mxu1 %v1372_v3 }
  0x83   :  { %1282 = vmatprep.subr.bf16.mxu1 %v1426_v17 }
  0x84   :  { %1263 = vmatpush3.bf16.msra.mxu0 %v1365_v24 }
  0x86   :  { %1283 = vmatpush3.bf16.msra.mxu1 %v1373_v4 }
 0x11a   :  { %v1158_v31 = vpop.f32.mrb[0].mxu0 }
 0x11b   :  { %v1180_v32 = vpop.f32.mrb[0].mxu1  ;;  %v1159_v33 = vpop.f32.mrb[1].mxu0 }
 0x11c   :  { %v1160_v34 = vadd.f32 %v1159_v33, %v1158_v31  ;;  %v1181_v35 = vpop.f32.mrb[1].mxu1  ;;  %v1161_v36 = vpop.f32.mrb[2].mxu0 }
 0x11d   :  { %v1182_v37 = vadd.f32 %v1181_v35, %v1180_v32  ;;  %v1183_v38 = vpop.f32.mrb[2].mxu1  ;;  %v1162_v39 = vpop.f32.mrb[3].mxu0 }
 0x11e   :  { %v1163_v40 = vadd.f32 %v1162_v39, %v1161_v36  ;;  %v1184_v41 = vpop.f32.mrb[3].mxu1 }
 0x11f   :  { %v701_v42 = vadd.f32 %v1182_v37, %v1160_v34  ;;  %v1185_v43 = vadd.f32 %v1184_v41, %v1183_v38 }
 0x121   :  { %v704_v44 = vadd.f32 %v1185_v43, %v1163_v40 }
 0x13a   :  { %v1202_v45 = vpop.f32.mrb[4].mxu0 }
 0x13b   :  { %v1224_v46 = vpop.f32.mrb[4].mxu1  ;;  %v1203_v47 = vpop.f32.mrb[5].mxu0 }
 0x13c   :  { %v1204_v48 = vadd.f32 %v1203_v47, %v1202_v45  ;;  %v1225_v49 = vpop.f32.mrb[5].mxu1  ;;  %v1205_v50 = vpop.f32.mrb[6].mxu0 }
 0x13d   :  { %v1226_v51 = vadd.f32 %v1225_v49, %v1224_v46  ;;  %v1227_v52 = vpop.f32.mrb[6].mxu1  ;;  %v1206_v53 = vpop.f32.mrb[7].mxu0 }
 0x13e   :  { %v742_v54 = vadd.f32 %v1204_v48, %v701_v42  ;;  %v1207_v55 = vadd.f32 %v1206_v53, %v1205_v50  ;;  %v1228_v56 = vpop.f32.mrb[7].mxu1 }
 0x13f   :  { %v1229_v58 = vadd.f32 %v1228_v56, %v1227_v52 }
 0x140   :  { %v783_v59 = vadd.f32 %v1226_v51, %v742_v54  ;;  %v745_v60 = vadd.f32 %v1207_v55, %v704_v44 }
 0x142   :  { %v805_v61 = vadd.f32 %v1123_v57, %v783_v59  ;;  %v786_v62 = vadd.f32 %v1229_v58, %v745_v60 }
 0x144   :  { %v807_v63 = vmax.f32 %v805_v61, 0.0  ;;  %v806_v0 = vadd.f32 %v1123_v57, %v786_v62 }
 0x146   :  { %809 = vst [vmem:[%s1591_s7] sm:$0xff] %v807_v63  ;;  %v808_v1 = vmax.f32 %v806_v0, 0.0 }
 0x148   :  { %810 = vst [vmem:[%s1591_s7 + $0x8] sm:$0xff] %v808_v1  ;;  %v811_v2 = vpack.c.bf16 %v808_v1, %v807_v63 }
 0x14a   :  { %1265 = vmatmul.mubr.bf16.vlgmr.msra.gmra.mrb[8].mxu0 %v811_v2 }
 0x21d   :  { %v917_v6 = vpop.f32.mrb[8].mxu0 }
 0x21e   :  { %v918_v7 = vadd.f32 %v1124_v5, %v917_v6  ;;  %v1266_v8 = vpop.f32.mrb[9].mxu0 }
 0x21f   :  { %v920_v9 = vpop.f32.mrb[10].mxu0 }
 0x220   :  { %v921_v10 = vadd.f32 %v1124_v5, %v920_v9  ;;  %v1267_v11 = vpop.f32.mrb[11].mxu0  ;;  %v924_v12 = vmax.f32 %v918_v7, 0.0 }
 0x222   :  { %v925_v13 = vmax.f32 %v921_v10, 0.0 }
 0x224   :  { %v926_v14 = vpack.c.bf16 %v925_v13, %v924_v12 }
 0x226   :  { %1285 = vmatmul.mubr.bf16.vlgmr.msra.gmra.mrb[8].mxu1 %v926_v14 }
 0x2f9   :  { %v1032_v16 = vpop.f32.mrb[8].mxu1 }
 0x2fa   :  { %v1033_v17 = vadd.f32 %v1133_v15, %v1032_v16  ;;  %v1286_v18 = vpop.f32.mrb[9].mxu1 }
 0x2fb   :  { %v1035_v19 = vpop.f32.mrb[10].mxu1 }
 0x2fc   :  { %1039 = vst [vmem:[%s1592_s8] sm:$0xff] %v1033_v17  ;;  %v1036_v20 = vadd.f32 %v1133_v15, %v1035_v19  ;;  %v1287_v21 = vpop.f32.mrb[11].mxu1 }
 0x2fe   :  { %1040 = vst [vmem:[%s1592_s8 + $0x8] sm:$0xff] %v1036_v20 }
 0x2ff   :  { %1049 = vsyncpa [#allocation4], 1 }
 0x300   :  { %1050 = vsyncpa [#allocation6], 1 }

</bundles_post_ra>
